<compile_context>
chip_gen: v7x
topology: tpu7x:2x2x1
jax: 0.10.0
libtpu: 0.0.40
codegen_flags: <defaults>
</compile_context>

<pallas_src>
import functools

import jax
import jax.numpy as jnp
from jax.experimental import pallas as pl
from jax.experimental.pallas import tpu as pltpu


def _round_up(x, m):
    return ((x + m - 1) // m) * m


def _ode_grad_kernel(ts_ref, y_ref, w1y_ref, w1t_ref, b1_ref, w2_ref, b2_ref,
                     out_ref, *, negate):
    """One grid step = one gradient-net evaluation at (ts[s], ys[s])."""
    s = pl.program_id(0)
    t = ts_ref[s]                                   # scalar from SMEM
    # t-dependent bias row, computed once per step: row == t*W1t + b1  (1, Hp)
    row = t * w1t_ref[...] + b1_ref[...]
    # layer 1: y @ W1y + row   (== concat([y, t]) @ W1 + b1)
    h = jnp.dot(y_ref[...], w1y_ref[...], preferred_element_type=jnp.float32)
    h = jnp.tanh(h + row)
    # layer 2: h @ W2 + b2
    g = jnp.dot(h, w2_ref[...], preferred_element_type=jnp.float32) + b2_ref[...]
    if negate:                                      # static Python branch
        g = -g
    out_ref[...] = g.astype(out_ref.dtype)


def ode_t_func_eval_steps(ts, ys, params, backwards=False):
    """Evaluate the ODE gradient net at S (t, y) pairs in one pallas_call.

    ts: (S,) float32 time points.
    ys: (S, B, D) float32 states.
    Returns (S, B, D) gradients (negated if backwards=True).
    """
    w1y, w1t, b1, w2, b2 = params
    S, B, D = ys.shape
    H = w1y.shape[1]

    # Lane/sublane-dense padding (zero padding is numerically exact).
    Bp = _round_up(B, 8)
    Dp = _round_up(D, 128)
    Hp = _round_up(H, 128)

    ys_p = jnp.pad(ys.astype(jnp.float32), ((0, 0), (0, Bp - B), (0, Dp - D)))
    w1y_p = jnp.pad(w1y.astype(jnp.float32), ((0, Dp - D), (0, Hp - H)))
    w1t_p = jnp.pad(w1t.astype(jnp.float32), ((0, 0), (0, Hp - H)))
    b1_p = jnp.pad(b1.astype(jnp.float32), ((0, 0), (0, Hp - H)))
    w2_p = jnp.pad(w2.astype(jnp.float32), ((0, Hp - H), (0, Dp - D)))
    b2_p = jnp.pad(b2.astype(jnp.float32), ((0, 0), (0, Dp - D)))
    ts_arr = jnp.asarray(ts, jnp.float32).reshape(S)

    kernel = functools.partial(_ode_grad_kernel, negate=bool(backwards))

    vmem = pltpu.MemorySpace.VMEM
    weight_bytes = 4 * (w1y_p.size + w1t_p.size + b1_p.size + w2_p.size + b2_p.size)
    cost = pl.CostEstimate(
        flops=2 * S * Bp * (Dp * Hp + Hp * Dp),
        transcendentals=S * Bp * Hp,
        bytes_accessed=weight_bytes + 4 * (ys_p.size + S * Bp * Dp + S),
    )

    out_p = pl.pallas_call(
        kernel,
        out_shape=jax.ShapeDtypeStruct((S, Bp, Dp), jnp.float32),
        grid=(S,),
        in_specs=[
            # time points: whole array resident in SMEM, indexed by program_id
            pl.BlockSpec(memory_space=pltpu.MemorySpace.SMEM),
            # per-step state tile (leading step dim squeezed out)
            pl.BlockSpec((None, Bp, Dp), lambda s: (s, 0, 0), memory_space=vmem),
            # weights: constant block index across steps -> stay resident in
            # VMEM, DMA'd from HBM only once per core.
            pl.BlockSpec((Dp, Hp), lambda s: (0, 0), memory_space=vmem),   # W1 (y part)
            pl.BlockSpec((1, Hp), lambda s: (0, 0), memory_space=vmem),    # W1 (t row)
            pl.BlockSpec((1, Hp), lambda s: (0, 0), memory_space=vmem),    # b1
            pl.BlockSpec((Hp, Dp), lambda s: (0, 0), memory_space=vmem),   # W2
            pl.BlockSpec((1, Dp), lambda s: (0, 0), memory_space=vmem),    # b2
        ],
        out_specs=pl.BlockSpec((None, Bp, Dp), lambda s: (s, 0, 0),
                               memory_space=vmem),
        compiler_params=pltpu.CompilerParams(
            dimension_semantics=("parallel",)),      # shard steps across TCs (v7x)
        cost_estimate=cost,
    )(ts_arr, ys_p, w1y_p, w1t_p, b1_p, w2_p, b2_p)

    return out_p[:, :B, :D]


def ode_t_func_forward(t_local, y, params, backwards=False):
    """Pallas equivalent of ODE_T_Func.forward(t_local, y, backwards)."""
    ts = jnp.asarray(t_local, jnp.float32).reshape(1)
    return ode_t_func_eval_steps(ts, y[None, ...], params, backwards)[0]


def _init_params(key, latent_dim, n_units):
    k1, k2, _ = jax.random.split(key, 3)
    # Deterministic synthetic weights (Linear(D+1 -> H), tanh, Linear(H -> D)).
    w1 = jax.random.normal(k1, (latent_dim + 1, n_units), jnp.float32) * 0.1
    b1 = jnp.zeros((1, n_units), jnp.float32)
    w2 = jax.random.normal(k2, (n_units, latent_dim), jnp.float32) * 0.1
    b2 = jnp.zeros((1, latent_dim), jnp.float32)
    w1y = w1[:latent_dim, :]          # (D, H)
    w1t = w1[latent_dim:, :]          # (1, H)  -> time column of the concat
    return (w1y, w1t, b1, w2, b2)


def _reference_steps(ts, ys, params, backwards=False):
    w1y, w1t, b1, w2, b2 = params

    def one(t, y):
        h = jnp.tanh(y @ w1y + t * w1t + b1)
        g = h @ w2 + b2
        return -g if backwards else g

    return jax.vmap(one)(jnp.asarray(ts, jnp.float32), ys)


if __name__ == "__main__":
    key = jax.random.PRNGKey(0)
    k_y, k_p, k_t = jax.random.split(key, 3)

    batch, latent_dim, n_units, n_steps = 8, 32, 64, 5
    params = _init_params(k_p, latent_dim, n_units)

    # Fused multi-step evaluation (many f(t, y) calls in one pallas_call).
    ys = jax.random.normal(k_y, (n_steps, batch, latent_dim), jnp.float32)
    ts = jnp.linspace(0.0, 1.0, n_steps, dtype=jnp.float32)

    grads = jax.block_until_ready(
        ode_t_func_eval_steps(ts, ys, params, backwards=False))
    grads_bwd = jax.block_until_ready(
        ode_t_func_eval_steps(ts, ys, params, backwards=True))

    ref = _reference_steps(ts, ys, params, backwards=False)
    ref_bwd = _reference_steps(ts, ys, params, backwards=True)

    assert grads.shape == (n_steps, batch, latent_dim)
    assert jnp.allclose(grads, ref, atol=1e-5, rtol=1e-5)
    assert jnp.allclose(grads_bwd, ref_bwd, atol=1e-5, rtol=1e-5)
    assert jnp.allclose(grads_bwd, -grads, atol=1e-6)

    # Single-call API matching ODE_T_Func.forward(t_local, y, backwards).
    y0 = ys[0]
    t0 = jnp.float32(0.5)
    g_fwd = jax.block_until_ready(
        ode_t_func_forward(t0, y0, params, backwards=False))
    g_bwd = jax.block_until_ready(
        ode_t_func_forward(t0, y0, params, backwards=True))
    r_fwd = _reference_steps(t0.reshape(1), y0[None], params, False)[0]
    assert g_fwd.shape == (batch, latent_dim)
    assert jnp.allclose(g_fwd, r_fwd, atol=1e-5, rtol=1e-5)
    assert jnp.allclose(g_bwd, -g_fwd, atol=1e-6)

    print("KERNEL_OK")
</pallas_src>

<mosaic_0001>
module attributes {stable_mosaic.version = 11 : i64} {
  func.func @_ode_grad_kernel(%arg0: i32, %arg1: memref<5xf32, #tpu.memory_space<smem>>, %arg2: memref<1x8x128xf32, #tpu.memory_space<vmem>>, %arg3: memref<128x128xf32, #tpu.memory_space<vmem>>, %arg4: memref<1x128xf32, #tpu.memory_space<vmem>>, %arg5: memref<1x128xf32, #tpu.memory_space<vmem>>, %arg6: memref<128x128xf32, #tpu.memory_space<vmem>>, %arg7: memref<1x128xf32, #tpu.memory_space<vmem>>, %arg8: memref<1x8x128xf32, #tpu.memory_space<vmem>>) attributes {dimension_semantics = [#tpu.dimension_semantics<parallel>], iteration_bounds = array<i64: 5>, scalar_prefetch = 0 : i64, scratch_operands = 0 : i64, tpu.core_type = #tpu.core_type<tc>, window_params = [{transform_indices = @transform_0, window_bounds = array<i64: 5>}, {transform_indices = @transform_1, window_bounds = array<i64: 1, 8, 128>}, {pipeline_mode = #tpu.pipeline_mode<synchronous>, transform_indices = @transform_2, window_bounds = array<i64: 128, 128>}, {pipeline_mode = #tpu.pipeline_mode<synchronous>, transform_indices = @transform_3, window_bounds = array<i64: 1, 128>}, {pipeline_mode = #tpu.pipeline_mode<synchronous>, transform_indices = @transform_4, window_bounds = array<i64: 1, 128>}, {pipeline_mode = #tpu.pipeline_mode<synchronous>, transform_indices = @transform_5, window_bounds = array<i64: 128, 128>}, {pipeline_mode = #tpu.pipeline_mode<synchronous>, transform_indices = @transform_6, window_bounds = array<i64: 1, 128>}, {transform_indices = @transform_7, window_bounds = array<i64: 1, 8, 128>}]} {
    %0 = arith.index_cast %arg0 : i32 to index
    %1 = memref.load %arg1[%0] : memref<5xf32, #tpu.memory_space<smem>>
    %c0 = arith.constant 0 : index
    %c0_0 = arith.constant 0 : index
    %2 = vector.load %arg4[%c0, %c0_0] : memref<1x128xf32, #tpu.memory_space<vmem>>, vector<1x128xf32>
    %3 = vector.broadcast %1 : f32 to vector<1x128xf32>
    %4 = arith.mulf %3, %2 : vector<1x128xf32>
    %c0_1 = arith.constant 0 : index
    %c0_2 = arith.constant 0 : index
    %5 = vector.load %arg5[%c0_1, %c0_2] : memref<1x128xf32, #tpu.memory_space<vmem>>, vector<1x128xf32>
    %6 = arith.addf %4, %5 : vector<1x128xf32>
    %c0_3 = arith.constant 0 : index
    %c0_4 = arith.constant 0 : index
    %c0_5 = arith.constant 0 : index
    %7 = vector.load %arg2[%c0_3, %c0_4, %c0_5] : memref<1x8x128xf32, #tpu.memory_space<vmem>>, vector<1x8x128xf32>
    %8 = vector.shape_cast %7 : vector<1x8x128xf32> to vector<8x128xf32>
    %c0_6 = arith.constant 0 : index
    %c0_7 = arith.constant 0 : index
    %9 = vector.load %arg3[%c0_6, %c0_7] : memref<128x128xf32, #tpu.memory_space<vmem>>, vector<128x128xf32>
    %cst = arith.constant dense<0.000000e+00> : vector<8x128xf32>
    %10 = tpu.matmul %8, %9, %cst {dimension_numbers = #tpu.dot_dimension_numbers<[1], [0], [0], [1], [0, 0, 1, 1], [], []>} : vector<8x128xf32>, vector<128x128xf32>, vector<8x128xf32> -> vector<8x128xf32>
    %11 = vector.broadcast %6 : vector<1x128xf32> to vector<8x128xf32>
    %12 = arith.addf %10, %11 : vector<8x128xf32>
    %13 = math.tanh %12 : vector<8x128xf32>
    %c0_8 = arith.constant 0 : index
    %c0_9 = arith.constant 0 : index
    %14 = vector.load %arg6[%c0_8, %c0_9] : memref<128x128xf32, #tpu.memory_space<vmem>>, vector<128x128xf32>
    %cst_10 = arith.constant dense<0.000000e+00> : vector<8x128xf32>
    %15 = tpu.matmul %13, %14, %cst_10 {dimension_numbers = #tpu.dot_dimension_numbers<[1], [0], [0], [1], [0, 0, 1, 1], [], []>} : vector<8x128xf32>, vector<128x128xf32>, vector<8x128xf32> -> vector<8x128xf32>
    %c0_11 = arith.constant 0 : index
    %c0_12 = arith.constant 0 : index
    %16 = vector.load %arg7[%c0_11, %c0_12] : memref<1x128xf32, #tpu.memory_space<vmem>>, vector<1x128xf32>
    %17 = vector.broadcast %16 : vector<1x128xf32> to vector<8x128xf32>
    %18 = arith.addf %15, %17 : vector<8x128xf32>
    %c0_13 = arith.constant 0 : index
    %c0_14 = arith.constant 0 : index
    %c0_15 = arith.constant 0 : index
    %19 = vector.load %arg8[%c0_13, %c0_14, %c0_15] : memref<1x8x128xf32, #tpu.memory_space<vmem>>, vector<1x8x128xf32>
    %20 = vector.shape_cast %19 : vector<1x8x128xf32> to vector<8x128xf32>
    %21 = vector.shape_cast %18 : vector<8x128xf32> to vector<1x8x128xf32>
    tpu.vector_store %arg8[%c0_13, %c0_14, %c0_15], %21 {strides = array<i32>} : memref<1x8x128xf32, #tpu.memory_space<vmem>>, vector<1x8x128xf32>,
    return
  }
  func.func @transform_0(%arg0: i32) -> i32 {
    %c0_i32 = arith.constant 0 : i32
    %c0_i32_0 = arith.constant 0 : i32
    return %c0_i32 : i32
  }
  func.func @transform_1(%arg0: i32) -> (i32, i32, i32) {
    %c0_i32 = arith.constant 0 : i32
    %c0_i32_0 = arith.constant 0 : i32
    %c0_i32_1 = arith.constant 0 : i32
    return %arg0, %c0_i32, %c0_i32_0 : i32, i32, i32
  }
  func.func @transform_2(%arg0: i32) -> (i32, i32) {
    %c0_i32 = arith.constant 0 : i32
    %c0_i32_0 = arith.constant 0 : i32
    %c0_i32_1 = arith.constant 0 : i32
    return %c0_i32, %c0_i32_0 : i32, i32
  }
  func.func @transform_3(%arg0: i32) -> (i32, i32) {
    %c0_i32 = arith.constant 0 : i32
    %c0_i32_0 = arith.constant 0 : i32
    %c0_i32_1 = arith.constant 0 : i32
    return %c0_i32, %c0_i32_0 : i32, i32
  }
  func.func @transform_4(%arg0: i32) -> (i32, i32) {
    %c0_i32 = arith.constant 0 : i32
    %c0_i32_0 = arith.constant 0 : i32
    %c0_i32_1 = arith.constant 0 : i32
    return %c0_i32, %c0_i32_0 : i32, i32
  }
  func.func @transform_5(%arg0: i32) -> (i32, i32) {
    %c0_i32 = arith.constant 0 : i32
    %c0_i32_0 = arith.constant 0 : i32
    %c0_i32_1 = arith.constant 0 : i32
    return %c0_i32, %c0_i32_0 : i32, i32
  }
  func.func @transform_6(%arg0: i32) -> (i32, i32) {
    %c0_i32 = arith.constant 0 : i32
    %c0_i32_0 = arith.constant 0 : i32
    %c0_i32_1 = arith.constant 0 : i32
    return %c0_i32, %c0_i32_0 : i32, i32
  }
  func.func @transform_7(%arg0: i32) -> (i32, i32, i32) {
    %c0_i32 = arith.constant 0 : i32
    %c0_i32_0 = arith.constant 0 : i32
    %c0_i32_1 = arith.constant 0 : i32
    return %arg0, %c0_i32, %c0_i32_0 : i32, i32, i32
  }
}

</mosaic_0001>

<bundles_post_ra>
// kernel: tpu_custom_call.1
= control target key start
LH: loop header
LB: loop body
LE: loop exit
PB: predicated region body
PF: predicated region fallthrough
CT: control target
= control target key end

     0   :  { %12 = vsyncpa [#allocation5], 0  ;;  %s1403_s0 = inlined_call_operand.hbm [shape: f32[5], index: 0, kind: input, shape index: {}]   ;;  %s1404_s1 = inlined_call_operand.hbm [shape: f32[5,8,128], index: 1, kind: input, shape index: {}]   ;;  %s1405_s2 = inlined_call_operand.hbm [shape: f32[128,128], index: 2, kind: input, shape index: {}]   ;;  %s1406_s3 = inlined_call_operand.vmem [shape: f32[1,128], index: 3, kind: input, shape index: {}]   ;;  %s1407_s4 = inlined_call_operand.vmem [shape: f32[1,128], index: 4, kind: input, shape index: {}]   ;;  %s1408_s5 = inlined_call_operand.hbm [shape: f32[128,128], index: 5, kind: input, shape index: {}]   ;;  %s1409_s6 = inlined_call_operand.vmem [shape: f32[1,128], index: 6, kind: input, shape index: {}]   ;;  %s1410_s7 = inlined_call_operand.hbm [shape: f32[5,8,128], index: 7, kind: output, shape index: {}]  }
   0x1   :  { %13 = vsyncpa [#allocation3], 0 }
   0x2   :  { %15 = vsyncpa [#allocation3 + $0x1], 0 }
   0x3   :  { %16 = vsyncpa [#allocation8], 0 }
   0x4   :  { %17 = vsyncpa [#allocation4], 0 }
   0x5   :  { %19 = vsyncpa [#allocation4 + $0x1], 0  ;;  %s1124_s24 = smov 0   ;;  %s1126_s25 = smov 0  }
   0x6   :  { %s1128_s26 = smov 0   ;;  %s1130_s27 = smov 0  }
   0x7 LB: > { %s1145_s28 = sadd.s32 4294967295, %s1072_s27   ;;  %s644_s29 = sadd.s32 4294967294, %s1072_s27   ;;  %s1072_s27 = sphi %s1130_s27, %s1435_s27   ;;  %s1068_s26 = sphi %s1128_s26, %s1434_s26   ;;  %s1064_s25 = sphi %s1126_s25, %s1433_s25   ;;  %s1060_s24 = sphi %s1124_s24, %s1432_s24  }
   0x8   : > { %p66_p0 = scmp.ne.s32.totalorder %s1064_s25, %s1060_s24  ;;  %p1411_p1 = scmp.eq.s32.totalorder %s1145_s28, 0 }
   0x9   : > { %p201_p3 = scmp.eq.s32.totalorder %s644_s29, 4  ;;  %p645_p5 = scmp.ge.s32.totalorder %s1072_s27, 1 }
   0xa   : > { %p1154_p4 = por %p1411_p1, %p66_p0  ;;  %p208_p7 = scmp.lt.s32.totalorder %s1072_s27, 6 }
   0xb   : > { %p1159_p6 = por %p201_p3, %p66_p0  ;;  %s1074_s10 = smov [#allocation7]  }
   0xc   : > { %s1415_s30 = scalar_select %p1154_p4, 1, 0 }
   0xd   : > { %s1416_s8 = scalar_select %p1159_p6, 1, 0 }
   0xe   : > { %p1164_p8 = pnand %p645_p5, %p208_p7  ;;  %s229_s11 = sshll.u32 %s1074_s10, 4  ;;  %s230_s11 = int_to_ptr.vmem [resolvable:$true] %s229_s11 }
   0xf   : > { %1417 = sst [smem:[#allocation15_spill]] %s1416_s8  ;;  %s1075_s13 = smov [#allocation9]  }
  0x10   : > { %s1418_s9 = scalar_select %p1164_p8, 1, 0 }
  0x11   : > { %p831_p9 = pneg %p1164_p8  ;;  %s248_s14 = sshll.u32 %s1075_s13, 4  ;;  %s1176_s14 = int_to_ptr.vmem [resolvable:$true] %s248_s14 }
  0x12   : > { %s899_s17 = scalar_lea.hbm %s1405_s2, 2048 }
  0x13   : > { %p1172_p10 = pnand %p831_p9, %p1411_p1  ;;  %p900_p11 = scmp.ne.s32.totalorder %s1405_s2, %s899_s17 }
  0x14   : > { %p906_p3 = scmp.lt.u32.totalorder %s899_s17, %s1405_s2 }
  0x15   : > { %p1186_p12 = pneg %p1172_p10 }
  0x17   : > { %p902_p13 = pnand %p1186_p12, %p900_p11 }
  0x19   : > { %p903_p0 = pneg %p902_p13 }
  0x1b   : > { %p908_p5 = pnand %p906_p3, %p903_p0 }
  0x1d   : > { %911 = shalt.err (!%p908_p5)
}
  0x1e   : > { %s912_s23 = scalar_lea.vmem %s230_s11, 2048  ;;  %p920_p2 = scmp.lt.s32.totalorder %s230_s11, %s230_s11 }
  0x1f   : > { %p913_p7 = scmp.ne.s32.totalorder %s230_s11, %s912_s23  ;;  %p921_p6 = scmp.lt.s32.totalorder %s912_s23, %s912_s23 }
  0x21   : > { %p915_p9 = pnand %p913_p7, %p1186_p12  ;;  %p922_p4 = por %p921_p6, %p920_p2 }
  0x23   : > { %p916_p1 = pneg %p915_p9 }
  0x25   : > { %p923_p8 = pnand %p922_p4, %p916_p1 }
  0x27   : > { %926 = shalt.err (!%p923_p8)
}
  0x28   : > { %s1076_s29 = smov 128   ;;  %s1077_s10 = smov 8  }
  0x29   : > { %837 = dma.hbm_to_vmem [thread:$0]  (!%p1172_p10), %s1405_s2, 2048, %s230_s11, [#allocation8], %s1076_s29, %s1076_s29, %s1077_s10  }
  0x2a   : > { %s927_s18 = scalar_lea.hbm %s1403_s0, 16 }
  0x2b   : > { %p928_p1 = scmp.ne.s32.totalorder %s1403_s0, %s927_s18  ;;  %p934_p6 = scmp.lt.u32.totalorder %s927_s18, %s1403_s0 }
  0x2d   : > { %p930_p2 = pnand %p928_p1, %p1186_p12 }
  0x2f   : > { %p931_p4 = pneg %p930_p2 }
  0x31   : > { %p936_p8 = pnand %p934_p6, %p931_p4 }
  0x33   : > { %939 = shalt.err (!%p936_p8)
}
  0x34   : > { %s1078_s8 = smov [#allocation2]   ;;  %s940_s17 = scalar_lea.hbm %s1408_s5, 2048 }
  0x35   : > { %834 = dma.hbm_to_smem (!%p1172_p10), %s1403_s0, 16, %s1078_s8, [#allocation5]  }
  0x36   : > { %p941_p11 = scmp.ne.s32.totalorder %s1408_s5, %s940_s17  ;;  %p947_p3 = scmp.lt.u32.totalorder %s940_s17, %s1408_s5 }
  0x38   : > { %p943_p13 = pnand %p941_p11, %p1186_p12 }
  0x3a   : > { %p944_p0 = pneg %p943_p13 }
  0x3c   : > { %p949_p5 = pnand %p947_p3, %p944_p0 }
  0x3e   : > { %952 = shalt.err (!%p949_p5)
}
  0x3f   : > { %s953_s8 = scalar_lea.vmem %s1176_s14, 2048  ;;  %p961_p2 = scmp.lt.s32.totalorder %s1176_s14, %s1176_s14 }
  0x40   : > { %p954_p7 = scmp.ne.s32.totalorder %s1176_s14, %s953_s8  ;;  %p962_p4 = scmp.lt.s32.totalorder %s953_s8, %s953_s8 }
  0x42   : > { %p956_p9 = pnand %p954_p7, %p1186_p12  ;;  %p963_p6 = por %p962_p4, %p961_p2 }
  0x44   : > { %p957_p1 = pneg %p956_p9 }
  0x46   : > { %p964_p8 = pnand %p963_p6, %p957_p1 }
  0x48   : > { %967 = shalt.err (!%p964_p8)
}
  0x49   : > { %840 = dma.hbm_to_vmem [thread:$0]  (!%p1172_p10), %s1408_s5, 2048, %s1176_s14, [#allocation8], %s1076_s29, %s1076_s29, %s1077_s10  }
  0x4a   : > { %s1248_s12 = sadd.s32 1, %s1072_s27   ;;  %s53_s13 = sadd.s32 1, %s1068_s26 }
  0x4b   : > { %s50_s20 = ssub.s32 %s1072_s27, %s1248_s12  ;;  %p60_p11 = scmp.ne.s32.totalorder %s1068_s26, %s1064_s25 }
  0x4c   : > { %p51_p12 = scmp.eq.s32.totalorder %s50_s20, 0  ;;  %p61_p13 = scmp.eq.s32.totalorder %s1072_s27, 0 }
  0x4d   : > { %p852_p0 = scmp.lt.s32.totalorder %s1072_s27, 5  ;;  %p1421_p5 = scmp.eq.s32.totalorder %s1145_s28, 4 }
  0x4e   : > { %s1258_s15 = scalar_select %p51_p12, %s1068_s26, %s53_s13  }
  0x4f   : > { %p62_p3 = por %p61_p13, %p60_p11  ;;  %p1262_p7 = por %p1421_p5, %p60_p11 }
  0x50   : > { %s265_s17 = sand.u32 1, %s1068_s26   ;;  %s651_s19 = sshll.u32 %s1072_s27, 7 }
  0x51   : > { %s650_s14 = sshll.u32 %s265_s17, 3  ;;  %s1271_s21 = scalar_lea.hbm %s1404_s1, %s651_s19 }
  0x52   : > { %s269_s18 = scalar_lea.vmem [#allocation6], %s650_s14  ;;  %p1273_p10 = pnand %p852_p0, %p62_p3 }
  0x53   : > { %s276_s22 = sshll.u32 %s269_s18, 4  ;;  %s266_s23 = scalar_lea.sflag [#allocation3], %s265_s17  ;;  %s1277_s22 = int_to_ptr.vmem [resolvable:$true] %s276_s22 }
  0x54   : > { %s968_s11 = scalar_lea.hbm %s1271_s21, 128  ;;  %p970_p1 = pneg %p1273_p10 }
  0x55   : > { %p969_p9 = scmp.ne.s32.totalorder %s1271_s21, %s968_s11  ;;  %s973_s19 = scalar_lea.hbm %s1404_s1, 640 }
  0x56   : > { %p974_p6 = scmp.lt.u32.totalorder %s1271_s21, %s1404_s1  ;;  %p975_p8 = scmp.lt.u32.totalorder %s973_s19, %s968_s11 }
  0x57   : > { %p971_p2 = pnand %p970_p1, %p969_p9  ;;  %p977_p11 = scmp.lt.u32.totalorder %s968_s11, %s1271_s21 }
  0x58   : > { %p976_p12 = por %p975_p8, %p974_p6 }
  0x59   : > { %p972_p4 = pneg %p971_p2 }
  0x5a   : > { %p978_p13 = por %p977_p11, %p976_p12 }
  0x5c   : > { %p979_p0 = pnand %p978_p13, %p972_p4 }
  0x5e   : > { %982 = shalt.err (!%p979_p0)
}
  0x5f   : > { %s983_s17 = scalar_lea.vmem %s1277_s22, 128  ;;  %s1079_s10 = smov [#allocation6]  }
  0x60   : > { %p984_p3 = scmp.ne.s32.totalorder %s1277_s22, %s983_s17  ;;  %s988_s18 = sshll.u32 %s1079_s10, 4  ;;  %s989_s18 = int_to_ptr.vmem [resolvable:$false] %s988_s18 }
  0x61   : > { %s990_s20 = scalar_lea.vmem %s989_s18, 256  ;;  %p991_p2 = scmp.lt.s32.totalorder %s1277_s22, %s989_s18 }
  0x62   : > { %p986_p5 = pnand %p984_p3, %p970_p1  ;;  %p992_p6 = scmp.lt.s32.totalorder %s990_s20, %s983_s17 }
  0x64   : > { %p987_p9 = pneg %p986_p5  ;;  %p993_p8 = por %p992_p6, %p991_p2 }
  0x66   : > { %p994_p12 = pnand %p993_p8, %p987_p9 }
  0x68   : > { %997 = shalt.err (!%p994_p12)
}
  0x69   : > { %844 = dma.hbm_to_vmem [thread:$0]  (!%p1273_p10), %s1271_s21, 128, %s1277_s22, %s266_s23  }
  0x6a   : > { %p1424_p4 = scmp.ne.s32.totalorder %s1418_s9, 0 }
  0x6b   : > { %p1425_p1 = scmp.eq.s32.totalorder (!%p1424_p4), %s1145_s28, 0 }
  0x6c   : > { %285 = sbr.rel (%p1424_p4) target bundleno = 612 (0x264), region = 48 }
  0x73   : > { %1043 = dma.done.wait (%p1425_p1), [#allocation5], 16   ;;  %p1426_p11 = pmov %p1425_p1 }
  0x74   : > { %s1311_s11 = sand.u32 1, %s1064_s25   ;;  %p1427_p10 = scmp.ne.s32.totalorder %s1415_s30, 0 }
  0x75   : > { %1045 = vsyncadd (%p1426_p11), [#allocation5], 4294967280  ;;  %s654_s8 = sshll.u32 %s1311_s11, 3  ;;  %s292_s13 = scalar_lea.sflag [#allocation3], %s1311_s11 }
  0x76   : > { %s1317_s21 = scalar_lea.vmem [#allocation6], %s654_s8 }
  0x77   : > { %1047 = dma.done.wait (%p1427_p10), %s292_s13, 128  }
  0x78   : > { %1049 = vsyncadd (%p1427_p10), %s292_s13, 4294967168  ;;  %p1428_p13 = pmov %p1425_p1 }
  0x79   : > { %p1429_p0 = pmov %p1425_p1 }
  0x7a   : > { %1051 = dma.done.wait (%p1428_p13), [#allocation8], 4096  }
  0x7b   : > { %1053 = vsyncadd (%p1429_p0), [#allocation8], 4294963200 }
  0x7c   : > { %308 = sfence }
  0x7d   : > { %v342_v0 = vld [vmem:[#allocation7] sm:$0xff]  ;;  %v343_v1 = vld [vmem:[#allocation7 + $0x8] sm:$0xff]  ;;  %v344_v2 = vld [vmem:[#allocation7 + $0x10] sm:$0xff]  ;;  %v1080_v3 = vmov 0.0|0.0   ;;  %vm1081_vm0 = vmmov 0   ;;  %v1082_v6 = vmov 0.0   ;;  %v359_v51 = vlaneseq }
  0x7e   : > { %767 = vmatprep.subr.bf16.mxu0 %v1080_v3  ;;  %v768_v4 = vpack.c.bf16 %v343_v1, %v342_v0  ;;  %v345_v5 = vld [vmem:[#allocation7 + $0x18] sm:$0xff]  ;;  %729 = vmatprep.mubr.msk.f32.mxu0 %vm1081_vm0, %v1082_v6  ;;  %v346_v8 = vld [vmem:[#allocation7 + $0x20] sm:$0xff]  ;;  %v347_v9 = vld [vmem:[#allocation7 + $0x28] sm:$0xff]  ;;  %s335_s30 = sld [smem:[#allocation2 + %s1145_s28]]  ;;  %s660_s17 = sshll.u32 %s1145_s28, 7 }
  0x7f   : > { %791 = vmatprep.subr.bf16.mxu1 %v1080_v3  ;;  %764 = vmatprep.mubr.msk.f32.mxu1 %vm1081_vm0, %v1082_v6  ;;  %v771_v7 = vpack.c.bf16 %v345_v5, %v344_v2  ;;  %v435_v10 = vld [vmem:[#allocation9] sm:$0xff]  ;;  %v436_v11 = vld [vmem:[#allocation9 + $0x8] sm:$0xff]  ;;  %v437_v12 = vld [vmem:[#allocation9 + $0x10] sm:$0xff]  ;;  %v774_v14 = vpack.c.bf16 %v347_v9, %v346_v8  ;;  %v360_v55 = vshrl.u32 %v359_v51, 7  ;;  %s334_s10 = scalar_lea.vmem [#allocation10], %s654_s8  ;;  %s1083_s28 = smov [#allocation10]  }
  0x80   : > { %769 = vmatpush3.bf16.msra.mxu0 %v768_v4  ;;  %v438_v13 = vld [vmem:[#allocation9 + $0x18] sm:$0xff]  ;;  %v792_v15 = vpack.c.bf16 %v436_v11, %v435_v10  ;;  %v348_v16 = vld [vmem:[#allocation7 + $0x30] sm:$0xff]  ;;  %v439_v19 = vld [vmem:[#allocation9 + $0x20] sm:$0xff]  ;;  %s543_s18 = sshll.u32 %s334_s10, 4  ;;  %s1002_s8 = sshll.u32 %s1083_s28, 4  ;;  %s1362_s18 = int_to_ptr.vmem [resolvable:$true] %s543_s18  ;;  %s1003_s8 = int_to_ptr.vmem [resolvable:$false] %s1002_s8 }
  0x81   : > { %770 = vmatprep.subr.bf16.mxu0 %v1080_v3  ;;  %v349_v17 = vld [vmem:[#allocation7 + $0x38] sm:$0xff]  ;;  %v795_v18 = vpack.c.bf16 %v438_v13, %v437_v12  ;;  %v440_v20 = vld [vmem:[#allocation9 + $0x28] sm:$0xff]  ;;  %v350_v22 = vld [vmem:[#allocation7 + $0x40] sm:$0xff]  ;;  %v361_v58 = vsub.s32 0, %v360_v55  ;;  %s998_s9 = scalar_lea.vmem %s1362_s18, 128  ;;  %s1004_s22 = scalar_lea.vmem %s1003_s8, 256 }
  0x82   : > { %793 = vmatpush3.bf16.msra.mxu1 %v792_v15  ;;  %v777_v21 = vpack.c.bf16 %v349_v17, %v348_v16  ;;  %v351_v23 = vld [vmem:[#allocation7 + $0x48] sm:$0xff]  ;;  %v798_v24 = vpack.c.bf16 %v440_v20, %v439_v19  ;;  %v441_v25 = vld [vmem:[#allocation9 + $0x30] sm:$0xff]  ;;  %v442_v26 = vld [vmem:[#allocation9 + $0x38] sm:$0xff]  ;;  %p999_p3 = scmp.ne.s32.totalorder %s1362_s18, %s998_s9  ;;  %p1005_p2 = scmp.lt.s32.totalorder %s1362_s18, %s1003_s8 }
  0x83   : > { %794 = vmatprep.subr.bf16.mxu1 %v1080_v3  ;;  %v780_v27 = vpack.c.bf16 %v351_v23, %v350_v22  ;;  %v352_v28 = vld [vmem:[#allocation7 + $0x50] sm:$0xff]  ;;  %v353_v29 = vld [vmem:[#allocation7 + $0x58] sm:$0xff]  ;;  %v801_v30 = vpack.c.bf16 %v442_v26, %v441_v25  ;;  %v443_v31 = vld [vmem:[#allocation9 + $0x40] sm:$0xff]  ;;  %p1006_p6 = scmp.lt.s32.totalorder %s1004_s22, %s998_s9 }
  0x84   : > { %772 = vmatpush3.bf16.msra.mxu0 %v771_v7  ;;  %v444_v32 = vld [vmem:[#allocation9 + $0x48] sm:$0xff]  ;;  %v783_v33 = vpack.c.bf16 %v353_v29, %v352_v28  ;;  %v354_v34 = vld [vmem:[#allocation7 + $0x60] sm:$0xff]  ;;  %v356_v38 = vld [vmem:[#allocation7 + $0x70] sm:$0xff]  ;;  %v337_v53 = vstv %s335_s30  ;;  %s530_s30 = scalar_lea.sflag [#allocation4], %s1311_s11  ;;  %p1000_p5 = pnand %p999_p3, %p1262_p7 }
  0x85   : > { %773 = vmatprep.subr.bf16.mxu0 %v1080_v3  ;;  %v355_v35 = vld [vmem:[#allocation7 + $0x68] sm:$0xff]  ;;  %v804_v36 = vpack.c.bf16 %v444_v32, %v443_v31  ;;  %v357_v39 = vld [vmem:[#allocation7 + $0x78] sm:$0xff]  ;;  %v445_v42 = vld [vmem:[#allocation9 + $0x50] sm:$0xff]  ;;  %p1007_p8 = por %p1006_p6, %p1005_p2 }
  0x86   : > { %796 = vmatpush3.bf16.msra.mxu1 %v795_v18  ;;  %v786_v37 = vpack.c.bf16 %v355_v35, %v354_v34  ;;  %v789_v40 = vpack.c.bf16 %v357_v39, %v356_v38  ;;  %v341_v41 = vld [vmem:[%s1317_s21] sm:$0xff]  ;;  %v447_v45 = vld [vmem:[#allocation9 + $0x60] sm:$0xff]  ;;  %v448_v46 = vld [vmem:[#allocation9 + $0x68] sm:$0xff]  ;;  %s1360_s21 = scalar_lea.hbm %s1410_s7, %s660_s17  ;;  %p1001_p9 = pneg %p1000_p5 }
  0x87   : > { %797 = vmatprep.subr.bf16.mxu1 %v1080_v3  ;;  %v446_v43 = vld [vmem:[#allocation9 + $0x58] sm:$0xff]  ;;  %v810_v47 = vpack.c.bf16 %v448_v46, %v447_v45  ;;  %v449_v48 = vld [vmem:[#allocation9 + $0x70] sm:$0xff] }
  0x88   : > { %775 = vmatpush3.bf16.msra.mxu0 %v774_v14  ;;  %v807_v44 = vpack.c.bf16 %v446_v43, %v445_v42  ;;  %v450_v49 = vld [vmem:[#allocation9 + $0x78] sm:$0xff]  ;;  %v336_v52 = vld [vmem:[%s1406_s3] sm:$0x1]  ;;  %p1008_p12 = pnand %p1007_p8, %p1001_p9 }
  0x89   : > { %776 = vmatprep.subr.bf16.mxu0 %v1080_v3  ;;  %v813_v50 = vpack.c.bf16 %v450_v49, %v449_v48  ;;  %v338_v54 = vmul.f32 %v337_v53, %v336_v52  ;;  %v339_v56 = vld [vmem:[%s1407_s4] sm:$0x1] }
  0x8a   : > { %799 = vmatpush3.bf16.msra.mxu1 %v798_v24  ;;  %v658_v0 = vld [vmem:[%s1409_s6] ss:$0 sm:$0xff] }
  0x8b   : > { %800 = vmatprep.subr.bf16.mxu1 %v1080_v3  ;;  %v340_v57 = vadd.f32 %v339_v56, %v338_v54 }
  0x8c   : > { %778 = vmatpush3.bf16.msra.mxu0 %v777_v21 }
  0x8d   : > { %779 = vmatprep.subr.bf16.mxu0 %v1080_v3  ;;  %v362_v59 = vrot.slane %v340_v57, %v361_v58 }
  0x8e   : > { %802 = vmatpush3.bf16.msra.mxu1 %v801_v30 }
  0x8f   : > { %803 = vmatprep.subr.bf16.mxu1 %v1080_v3 }
  0x90   : > { %781 = vmatpush3.bf16.msra.mxu0 %v780_v27 }
  0x91   : > { %782 = vmatprep.subr.bf16.mxu0 %v1080_v3 }
  0x92   : > { %805 = vmatpush3.bf16.msra.mxu1 %v804_v36 }
  0x93   : > { %806 = vmatprep.subr.bf16.mxu1 %v1080_v3 }
  0x94   : > { %784 = vmatpush3.bf16.msra.mxu0 %v783_v33 }
  0x95   : > { %785 = vmatprep.subr.bf16.mxu0 %v1080_v3 }
  0x96   : > { %808 = vmatpush3.bf16.msra.mxu1 %v807_v44 }
  0x97   : > { %809 = vmatprep.subr.bf16.mxu1 %v1080_v3 }
  0x98   : > { %787 = vmatpush3.bf16.msra.mxu0 %v786_v37 }
  0x99   : > { %788 = vmatprep.subr.bf16.mxu0 %v1080_v3 }
  0x9a   : > { %811 = vmatpush3.bf16.msra.mxu1 %v810_v47 }
  0x9b   : > { %812 = vmatprep.subr.bf16.mxu1 %v1080_v3 }
  0x9c   : > { %790 = vmatpush3.bf16.msra.mxu0 %v789_v40 }
  0x9e   : > { %814 = vmatpush3.bf16.msra.mxu1 %v813_v50 }
  0x9f   : > { %730 = vmatmul.mubr.f32.vlgmr.msra.gmra.mrb[0].mxu0 %v341_v41 }
 0x172   : > { %v430_v60 = vpop.f32.mrb[0].mxu0 }
 0x173   : > { %v431_v61 = vadd.f32 %v430_v60, %v362_v59  ;;  %v731_v62 = vpop.f32.mrb[1].mxu0 }
 0x175   : > { %897 = vtanh.f32 %v431_v61 }
 0x17f   : > { %v898_v63 = vpop.eup %897 }
 0x180   : > { %765 = vmatmul.mubr.f32.vlgmr.msra.gmra.mrb[0].mxu1 %v898_v63 }
 0x253   : > { %v524_v1 = vpop.f32.mrb[0].mxu1 }
 0x254   : > { %v525_v2 = vadd.f32 %v658_v0, %v524_v1  ;;  %v766_v3 = vpop.f32.mrb[1].mxu1 }
 0x256   : > { %528 = vst [vmem:[%s334_s10] sm:$0xff] %v525_v2 }
 0x257   : > { %1011 = shalt.err (!%p1008_p12)
}
 0x258   : > { %s1012_s11 = scalar_lea.hbm %s1360_s21, 128  ;;  %s1016_s14 = scalar_lea.hbm %s1410_s7, 640 }
 0x259   : > { %p1013_p4 = scmp.ne.s32.totalorder %s1360_s21, %s1012_s11  ;;  %p1017_p10 = scmp.lt.u32.totalorder %s1360_s21, %s1410_s7 }
 0x25a   : > { %p1018_p13 = scmp.lt.u32.totalorder %s1016_s14, %s1012_s11  ;;  %p1020_p3 = scmp.lt.u32.totalorder %s1012_s11, %s1360_s21 }
 0x25b   : > { %p1014_p1 = pnand %p1013_p4, %p1262_p7 }
 0x25c   : > { %p1019_p0 = por %p1018_p13, %p1017_p10 }
 0x25d   : > { %p1015_p11 = pneg %p1014_p1 }
 0x25e   : > { %p1021_p5 = por %p1020_p3, %p1019_p0 }
 0x260   : > { %p1022_p9 = pnand %p1021_p5, %p1015_p11 }
 0x262   : > { %1025 = shalt.err (!%p1022_p9)
}
 0x263   : > { %829 = dma.vmem_to_hbm [thread:$0]  (%p1262_p7), %s1362_s18, 128, %s1360_s21, %s530_s30  }
 0x264 PF: > { %s1430_s10 = sld [smem:[#allocation15_spill]]  ;;  %p856_p2 = scmp.ge.s32.totalorder %s1072_s27, 2 }
 0x265   : > { %s555_s20 = sand.u32 1, %s1060_s24  }
 0x266   : > { %s556_s13 = scalar_lea.sflag [#allocation4], %s555_s20 }
 0x26a   : > { %p1431_p6 = scmp.ne.s32.totalorder %s1430_s10, 0 }
 0x26c   : > { %p846_p8 = pnand %p856_p2, %p1431_p6 }
 0x26e   : > { %1055 = dma.done.wait (!%p846_p8), %s556_s13, 128  }
 0x26f   : > { %1057 = vsyncadd (!%p846_p8), %s556_s13, 4294967168  ;;  %p22_p12 = scmp.ge.s32.totalorder %s1248_s12, 7   ;;  %s1432_s24 = smov %s1064_s25 }
 0x270   : > { %s1433_s25 = smov %s1068_s26  ;;  %s1434_s26 = smov %s1258_s15 }
 0x271   : > { %s1435_s27 = smov %s1248_s12  ;;  %24 = sbr.rel (!%p22_p12) target bundleno = 7 (0x7), region = 106 }
 0x278   :  { %561 = vsyncpa [#allocation3], 1 }
 0x279   :  { %563 = vsyncpa [#allocation3 + $0x1], 1 }
 0x27a   :  { %564 = vsyncpa [#allocation8], 1 }
 0x27b   :  { %565 = vsyncpa [#allocation4], 1 }
 0x27c   :  { %567 = vsyncpa [#allocation4 + $0x1], 1 }
 0x27d   :  { %568 = vsyncpa [#allocation5], 1 }
 0x27e   :  { %570 = vsyncpa [#allocation5 + $0x1], 1 }

</bundles_post_ra>
